<compile_context>
chip_gen: v7x
topology: tpu7x:2x2x1
jax: 0.10.0
libtpu: 0.0.40
codegen_flags: <defaults>
</compile_context>

<pallas_src>
import math

import jax
import jax.numpy as jnp
from jax.experimental import pallas as pl
from jax.experimental.pallas import tpu as pltpu

H1, H2 = 128, 256      # hidden widths of the MLP
A_PAD = 128            # lane-padded action dimension (softmax over full lanes)
LANES = 256            # slab lane width (widest layer)
BIAS_ROWS = 16         # bias block rows (keeps bf16 sublane tiling aligned)
NEG_INF = -1e30


def _round_up(x, m):
    return -(-x // m) * m


def _s_pad(state_size):
    # Pad the state dim to a multiple of 16 so all bf16 slab row-slices are
    # sublane-tile aligned.
    return max(16, _round_up(state_size, 16))


def _b_pad(batch):
    # bf16 vregs pack [16, 128]; a 16-row LHS avoids half-filled packed tiles.
    return max(16, _round_up(batch, 16))


def _leaky_relu(x):
    # max(x, 0.01*x): one vmul + one vmax instead of cmp + mul + select.
    return jnp.maximum(x, 0.01 * x)


def actor_kernel(x_ref, p_ref, out_ref, xpad_ref):
    """Shared body for the single-call and grid-over-steps entry points.

    x_ref   : (batch, state_size) raw input (any float dtype)
    p_ref   : (rows, LANES) bf16 packed parameter slab
    out_ref : (batch, action_size) f32 probabilities
    xpad_ref: (b_pad, s_pad) f32 VMEM scratch for the padded/normalized state
    """
    batch, state_size = x_ref.shape
    out_b, action_size = out_ref.shape
    b_pad, s_pad = xpad_ref.shape

    # Static row offsets into the packed parameter slab.
    r_w1 = 0
    r_w2 = r_w1 + s_pad
    r_w3 = r_w2 + H1
    r_w4 = r_w3 + H2
    r_b = r_w4 + H2

    # In-kernel zero-pad of the state block (replaces two wrapper-side HLOs).
    xpad_ref[...] = jnp.zeros_like(xpad_ref)
    xpad_ref[0:batch, 0:state_size] = x_ref[...].astype(jnp.float32)
    x = xpad_ref[...]

    # F.normalize(state, p=2, dim=0): per-feature L2 norm over the batch with
    # PyTorch's eps=1e-12 clamp. rsqrt(max(ss, eps^2)) == 1/max(||x||, eps).
    # Zero pad rows/cols add nothing to the sum of squares.
    ss = jnp.sum(x * x, axis=0, keepdims=True)
    x = x * jax.lax.rsqrt(jnp.maximum(ss, 1e-24))

    # Biases: one (1, N) row each; broadcast happens at the add.
    b1 = p_ref[r_b + 0:r_b + 1, 0:H1].astype(jnp.float32)
    b2 = p_ref[r_b + 1:r_b + 2, 0:H2].astype(jnp.float32)
    b3 = p_ref[r_b + 2:r_b + 3, 0:H2].astype(jnp.float32)
    b4 = p_ref[r_b + 3:r_b + 4, 0:A_PAD].astype(jnp.float32)   # pad lanes = -1e30

    h = _leaky_relu(jnp.dot(x.astype(jnp.bfloat16), p_ref[r_w1:r_w2, 0:H1],
                            preferred_element_type=jnp.float32) + b1)
    h = _leaky_relu(jnp.dot(h.astype(jnp.bfloat16), p_ref[r_w2:r_w3, 0:H2],
                            preferred_element_type=jnp.float32) + b2)
    h = _leaky_relu(jnp.dot(h.astype(jnp.bfloat16), p_ref[r_w3:r_w4, 0:H2],
                            preferred_element_type=jnp.float32) + b3)
    logits = jnp.dot(h.astype(jnp.bfloat16), p_ref[r_w4:r_b, 0:A_PAD],
                     preferred_element_type=jnp.float32) + b4

    # Stable softmax over the lane-padded action dim; pad lanes carry a -1e30
    # bias so exp(pad - m) == 0 and they contribute nothing to the denominator.
    # Exact divide (not approx reciprocal) so each row sums to 1 to f32 rounding.
    m = jnp.max(logits, axis=-1, keepdims=True)
    e = jnp.exp(logits - m)
    denom = jnp.sum(e, axis=-1, keepdims=True)
    probs = e / denom

    # Store only the real (batch, action) window; pads never leave the kernel.
    out_ref[...] = probs[0:out_b, 0:action_size].astype(out_ref.dtype)


def pack_params(params, state_size, action_size):
    """Pack all weights + biases into one lane-dense bf16 slab (single DMA)."""
    s_pad = _s_pad(state_size)
    rows = s_pad + H1 + H2 + H2 + BIAS_ROWS
    slab = jnp.zeros((rows, LANES), jnp.float32)

    slab = slab.at[:state_size, :H1].set(params["w1"])
    r = s_pad
    slab = slab.at[r:r + H1, :H2].set(params["w2"]); r += H1
    slab = slab.at[r:r + H2, :H2].set(params["w3"]); r += H2
    slab = slab.at[r:r + H2, :action_size].set(params["w4"]); r += H2

    slab = slab.at[r + 0, :H1].set(params["b1"].reshape(-1))
    slab = slab.at[r + 1, :H2].set(params["b2"].reshape(-1))
    slab = slab.at[r + 2, :H2].set(params["b3"].reshape(-1))
    b4_row = jnp.full((A_PAD,), NEG_INF, jnp.float32)
    b4_row = b4_row.at[:action_size].set(params["b4"].reshape(-1))
    slab = slab.at[r + 3, :A_PAD].set(b4_row)

    return slab.astype(jnp.bfloat16)


def _cost_estimate(b_pad, s_pad, packed, batch, state_size, action_size, steps=1):
    per_step_flops = 2 * b_pad * (s_pad * H1 + H1 * H2 + H2 * H2 + H2 * A_PAD)
    return pl.CostEstimate(
        flops=steps * per_step_flops,
        transcendentals=steps * b_pad * A_PAD,
        bytes_accessed=(packed.size * 2
                        + steps * (batch * state_size * 4
                                   + batch * action_size * 4)),
    )


def actor_forward(x, packed, state_size, action_size):
    """Single forward call. Returns (probs, probs) ~ (Categorical(p), p.detach())."""
    batch = x.shape[0]
    b_pad, s_pad = _b_pad(batch), _s_pad(state_size)
    vmem = pl.BlockSpec(memory_space=pltpu.MemorySpace.VMEM)
    probs = pl.pallas_call(
        actor_kernel,
        out_shape=jax.ShapeDtypeStruct((batch, action_size), jnp.float32),
        in_specs=[vmem, vmem],
        out_specs=vmem,
        scratch_shapes=[pltpu.VMEM((b_pad, s_pad), jnp.float32)],
        cost_estimate=_cost_estimate(b_pad, s_pad, packed, batch,
                                     state_size, action_size),
    )(x, packed)
    return probs, probs


def actor_forward_steps(xs, packed, state_size, action_size):
    """Fused T-step forward: xs is (T, batch, state_size) -> (T, batch, actions).

    The weight slab's index_map is constant, so it is DMA'd into VMEM once and
    stays resident across the whole grid; the step axis is "parallel" so v7x's
    second TensorCore can process half the steps.
    """
    steps, batch, _ = xs.shape
    b_pad, s_pad = _b_pad(batch), _s_pad(state_size)
    probs = pl.pallas_call(
        actor_kernel,
        out_shape=jax.ShapeDtypeStruct((steps, batch, action_size), jnp.float32),
        grid=(steps,),
        in_specs=[
            pl.BlockSpec((None, batch, xs.shape[2]), lambda t: (t, 0, 0)),
            pl.BlockSpec(packed.shape, lambda t: (0, 0)),   # resident slab
        ],
        out_specs=pl.BlockSpec((None, batch, action_size), lambda t: (t, 0, 0)),
        scratch_shapes=[pltpu.VMEM((b_pad, s_pad), jnp.float32)],
        compiler_params=pltpu.CompilerParams(dimension_semantics=("parallel",)),
        cost_estimate=_cost_estimate(b_pad, s_pad, packed, batch,
                                     state_size, action_size, steps=steps),
    )(xs, packed)
    return probs, probs


def init_params(key, state_size, action_size):
    """PyTorch-default-style init: U(-1/sqrt(fan_in), 1/sqrt(fan_in))."""
    sizes = [(state_size, H1), (H1, H2), (H2, H2), (H2, action_size)]
    params = {}
    keys = jax.random.split(key, 2 * len(sizes))
    for i, (fan_in, fan_out) in enumerate(sizes):
        bound = 1.0 / math.sqrt(fan_in)
        params[f"w{i+1}"] = jax.random.uniform(
            keys[2 * i], (fan_in, fan_out), jnp.float32, -bound, bound)
        params[f"b{i+1}"] = jax.random.uniform(
            keys[2 * i + 1], (1, fan_out), jnp.float32, -bound, bound)
    return params


def actor_forward_ref(x, params):
    """Pure-JAX reference using the same bf16 operand rounding as the kernel."""
    x = x.astype(jnp.float32)
    x = x / jnp.maximum(jnp.sqrt(jnp.sum(x * x, axis=0, keepdims=True)), 1e-12)

    def layer(h, w, b, act=True):
        y = jnp.dot(h.astype(jnp.bfloat16), w.astype(jnp.bfloat16),
                    preferred_element_type=jnp.float32)
        y = y + b.astype(jnp.bfloat16).astype(jnp.float32)
        return _leaky_relu(y) if act else y

    h = layer(x, params["w1"], params["b1"])
    h = layer(h, params["w2"], params["b2"])
    h = layer(h, params["w3"], params["b3"])
    logits = layer(h, params["w4"], params["b4"], act=False)
    return jax.nn.softmax(logits, axis=-1)


if __name__ == "__main__":
    state_size, action_size, batch, steps = 4, 2, 16, 4

    key = jax.random.PRNGKey(0)
    k_params, k_state, k_steps = jax.random.split(key, 3)
    params = init_params(k_params, state_size, action_size)
    packed = pack_params(params, state_size, action_size)

    # Single forward call (mirrors the module's forward()).
    state = jax.random.normal(k_state, (batch, state_size), jnp.float32)
    probs, test = actor_forward(state, packed, state_size, action_size)
    probs = jax.block_until_ready(probs)
    test = jax.block_until_ready(test)
    ref = actor_forward_ref(state, params)
    assert probs.shape == (batch, action_size)
    assert jnp.allclose(probs, ref, atol=5e-3, rtol=5e-3), float(
        jnp.max(jnp.abs(probs - ref)))
    assert jnp.allclose(jnp.sum(probs, axis=-1), 1.0, atol=1e-3)

    # Fused multi-step path: weight slab DMA'd once, resident across the grid.
    states = jax.random.normal(k_steps, (steps, batch, state_size), jnp.float32)
    probs_s, _ = actor_forward_steps(states, packed, state_size, action_size)
    probs_s = jax.block_until_ready(probs_s)
    ref_s = jax.vmap(lambda s: actor_forward_ref(s, params))(states)
    assert probs_s.shape == (steps, batch, action_size)
    assert jnp.allclose(probs_s, ref_s, atol=5e-3, rtol=5e-3), float(
        jnp.max(jnp.abs(probs_s - ref_s)))
    assert jnp.allclose(jnp.sum(probs_s, axis=-1), 1.0, atol=1e-3)

    print("KERNEL_OK")
</pallas_src>

<mosaic_0001>
module attributes {stable_mosaic.version = 11 : i64} {
  func.func @actor_kernel(%arg0: memref<16x4xf32, #tpu.memory_space<vmem>>, %arg1: memref<672x256xbf16, #tpu.memory_space<vmem>>, %arg2: memref<16x2xf32, #tpu.memory_space<vmem>>, %arg3: memref<16x16xf32, #tpu.memory_space<vmem>>) attributes {dimension_semantics = [], scalar_prefetch = 0 : i64, scratch_operands = 1 : i64, tpu.core_type = #tpu.core_type<tc>} {
    %cst = arith.constant 0.000000e+00 : f32
    %0 = vector.broadcast %cst : f32 to vector<16x16xf32>
    %c0 = arith.constant 0 : index
    %c0_0 = arith.constant 0 : index
    %1 = vector.load %arg3[%c0, %c0_0] : memref<16x16xf32, #tpu.memory_space<vmem>>, vector<16x16xf32>
    tpu.vector_store %arg3[%c0, %c0_0], %0 {strides = array<i32>} : memref<16x16xf32, #tpu.memory_space<vmem>>, vector<16x16xf32>,
    %c0_1 = arith.constant 0 : index
    %c0_2 = arith.constant 0 : index
    %2 = vector.load %arg0[%c0_1, %c0_2] : memref<16x4xf32, #tpu.memory_space<vmem>>, vector<16x4xf32>
    %c0_3 = arith.constant 0 : index
    %c0_4 = arith.constant 0 : index
    %3 = vector.load %arg3[%c0_3, %c0_4] : memref<16x16xf32, #tpu.memory_space<vmem>>, vector<16x4xf32>
    tpu.vector_store %arg3[%c0_3, %c0_4], %2 {strides = array<i32>} : memref<16x16xf32, #tpu.memory_space<vmem>>, vector<16x4xf32>,
    %c0_5 = arith.constant 0 : index
    %c0_6 = arith.constant 0 : index
    %4 = vector.load %arg3[%c0_5, %c0_6] : memref<16x16xf32, #tpu.memory_space<vmem>>, vector<16x16xf32>
    %5 = arith.mulf %4, %4 : vector<16x16xf32>
    %cst_7 = arith.constant dense<0.000000e+00> : vector<16xf32>
    %6 = vector.multi_reduction <add>, %5, %cst_7 [0] : vector<16x16xf32> to vector<16xf32>
    %7 = vector.shape_cast %6 : vector<16xf32> to vector<1x16xf32>
    %cst_8 = arith.constant 1.000000e-24 : f32
    %8 = vector.broadcast %cst_8 : f32 to vector<1x16xf32>
    %9 = arith.maximumf %7, %8 : vector<1x16xf32>
    %10 = math.rsqrt %9 : vector<1x16xf32>
    %11 = vector.broadcast %10 : vector<1x16xf32> to vector<16x16xf32>
    %12 = arith.mulf %4, %11 : vector<16x16xf32>
    %c656 = arith.constant 656 : index
    %c0_9 = arith.constant 0 : index
    %13 = vector.load %arg1[%c656, %c0_9] : memref<672x256xbf16, #tpu.memory_space<vmem>>, vector<1x128xbf16>
    %14 = arith.extf %13 : vector<1x128xbf16> to vector<1x128xf32>
    %c657 = arith.constant 657 : index
    %c0_10 = arith.constant 0 : index
    %15 = vector.load %arg1[%c657, %c0_10] : memref<672x256xbf16, #tpu.memory_space<vmem>>, vector<1x256xbf16>
    %16 = arith.extf %15 : vector<1x256xbf16> to vector<1x256xf32>
    %c658 = arith.constant 658 : index
    %c0_11 = arith.constant 0 : index
    %17 = vector.load %arg1[%c658, %c0_11] : memref<672x256xbf16, #tpu.memory_space<vmem>>, vector<1x256xbf16>
    %18 = arith.extf %17 : vector<1x256xbf16> to vector<1x256xf32>
    %c659 = arith.constant 659 : index
    %c0_12 = arith.constant 0 : index
    %19 = vector.load %arg1[%c659, %c0_12] : memref<672x256xbf16, #tpu.memory_space<vmem>>, vector<1x128xbf16>
    %20 = arith.extf %19 : vector<1x128xbf16> to vector<1x128xf32>
    %21 = arith.truncf %12 : vector<16x16xf32> to vector<16x16xbf16>
    %c0_13 = arith.constant 0 : index
    %c0_14 = arith.constant 0 : index
    %22 = vector.load %arg1[%c0_13, %c0_14] : memref<672x256xbf16, #tpu.memory_space<vmem>>, vector<16x128xbf16>
    %cst_15 = arith.constant dense<0.000000e+00> : vector<16x128xf32>
    %23 = tpu.matmul %21, %22, %cst_15 {dimension_numbers = #tpu.dot_dimension_numbers<[1], [0], [0], [1], [0, 0, 1, 1], [], []>} : vector<16x16xbf16>, vector<16x128xbf16>, vector<16x128xf32> -> vector<16x128xf32>
    %24 = vector.broadcast %14 : vector<1x128xf32> to vector<16x128xf32>
    %25 = arith.addf %23, %24 : vector<16x128xf32>
    %cst_16 = arith.constant 0.00999999977 : f32
    %26 = vector.broadcast %cst_16 : f32 to vector<16x128xf32>
    %27 = arith.mulf %26, %25 : vector<16x128xf32>
    %28 = arith.maximumf %25, %27 : vector<16x128xf32>
    %29 = arith.truncf %28 : vector<16x128xf32> to vector<16x128xbf16>
    %c16 = arith.constant 16 : index
    %c0_17 = arith.constant 0 : index
    %30 = vector.load %arg1[%c16, %c0_17] : memref<672x256xbf16, #tpu.memory_space<vmem>>, vector<128x256xbf16>
    %cst_18 = arith.constant dense<0.000000e+00> : vector<16x256xf32>
    %31 = tpu.matmul %29, %30, %cst_18 {dimension_numbers = #tpu.dot_dimension_numbers<[1], [0], [0], [1], [0, 0, 1, 1], [], []>} : vector<16x128xbf16>, vector<128x256xbf16>, vector<16x256xf32> -> vector<16x256xf32>
    %32 = vector.broadcast %16 : vector<1x256xf32> to vector<16x256xf32>
    %33 = arith.addf %31, %32 : vector<16x256xf32>
    %cst_19 = arith.constant 0.00999999977 : f32
    %34 = vector.broadcast %cst_19 : f32 to vector<16x256xf32>
    %35 = arith.mulf %34, %33 : vector<16x256xf32>
    %36 = arith.maximumf %33, %35 : vector<16x256xf32>
    %37 = arith.truncf %36 : vector<16x256xf32> to vector<16x256xbf16>
    %c144 = arith.constant 144 : index
    %c0_20 = arith.constant 0 : index
    %38 = vector.load %arg1[%c144, %c0_20] : memref<672x256xbf16, #tpu.memory_space<vmem>>, vector<256x256xbf16>
    %cst_21 = arith.constant dense<0.000000e+00> : vector<16x256xf32>
    %39 = tpu.matmul %37, %38, %cst_21 {dimension_numbers = #tpu.dot_dimension_numbers<[1], [0], [0], [1], [0, 0, 1, 1], [], []>} : vector<16x256xbf16>, vector<256x256xbf16>, vector<16x256xf32> -> vector<16x256xf32>
    %40 = vector.broadcast %18 : vector<1x256xf32> to vector<16x256xf32>
    %41 = arith.addf %39, %40 : vector<16x256xf32>
    %cst_22 = arith.constant 0.00999999977 : f32
    %42 = vector.broadcast %cst_22 : f32 to vector<16x256xf32>
    %43 = arith.mulf %42, %41 : vector<16x256xf32>
    %44 = arith.maximumf %41, %43 : vector<16x256xf32>
    %45 = arith.truncf %44 : vector<16x256xf32> to vector<16x256xbf16>
    %c400 = arith.constant 400 : index
    %c0_23 = arith.constant 0 : index
    %46 = vector.load %arg1[%c400, %c0_23] : memref<672x256xbf16, #tpu.memory_space<vmem>>, vector<256x128xbf16>
    %cst_24 = arith.constant dense<0.000000e+00> : vector<16x128xf32>
    %47 = tpu.matmul %45, %46, %cst_24 {dimension_numbers = #tpu.dot_dimension_numbers<[1], [0], [0], [1], [0, 0, 1, 1], [], []>} : vector<16x256xbf16>, vector<256x128xbf16>, vector<16x128xf32> -> vector<16x128xf32>
    %48 = vector.broadcast %20 : vector<1x128xf32> to vector<16x128xf32>
    %49 = arith.addf %47, %48 : vector<16x128xf32>
    %cst_25 = arith.constant dense<0xFF800000> : vector<16xf32>
    %50 = vector.multi_reduction <maximumf>, %49, %cst_25 [1] : vector<16x128xf32> to vector<16xf32>
    %51 = vector.shape_cast %50 : vector<16xf32> to vector<16x1xf32>
    %52 = vector.broadcast %51 : vector<16x1xf32> to vector<16x128xf32>
    %53 = arith.subf %49, %52 : vector<16x128xf32>
    %54 = math.exp %53 : vector<16x128xf32>
    %cst_26 = arith.constant dense<0.000000e+00> : vector<16xf32>
    %55 = vector.multi_reduction <add>, %54, %cst_26 [1] : vector<16x128xf32> to vector<16xf32>
    %56 = vector.shape_cast %55 : vector<16xf32> to vector<16x1xf32>
    %57 = vector.broadcast %56 : vector<16x1xf32> to vector<16x128xf32>
    %58 = arith.divf %54, %57 : vector<16x128xf32>
    %59 = vector.extract_strided_slice %58 {offsets = [0, 0], sizes = [16, 2], strides = [1, 1]} : vector<16x128xf32> to vector<16x2xf32>
    %c0_27 = arith.constant 0 : index
    %c0_28 = arith.constant 0 : index
    %60 = vector.load %arg2[%c0_27, %c0_28] : memref<16x2xf32, #tpu.memory_space<vmem>>, vector<16x2xf32>
    tpu.vector_store %arg2[%c0_27, %c0_28], %59 {strides = array<i32>} : memref<16x2xf32, #tpu.memory_space<vmem>>, vector<16x2xf32>,
    return
  }
}

</mosaic_0001>

<bundles_post_ra>
// kernel: tpu_custom_call.1
= control target key start
LH: loop header
LB: loop body
LE: loop exit
PB: predicated region body
PF: predicated region fallthrough
CT: control target
= control target key end

     0   :  { %7 = vsyncpa [#allocation4], 0  ;;  %s957_s9 = smov [#allocation3]   ;;  %s1013_s0 = inlined_call_operand.vmem [shape: f32[16,4], index: 0, kind: input, shape index: {}]   ;;  %s1014_s1 = inlined_call_operand.hbm [shape: bf16[672,256], index: 1, kind: input, shape index: {}]   ;;  %s1015_s2 = inlined_call_operand.vmem [shape: f32[16,2], index: 2, kind: output, shape index: {}]  }
   0x1   :  { %s15_s10 = sshll.u32 %s957_s9, 4  ;;  %s933_s13 = scalar_lea.hbm %s1014_s1, 10752  ;;  %s16_s10 = int_to_ptr.vmem [resolvable:$true] %s15_s10 }
   0x2   :  { %p934_p0 = scmp.ne.s32.totalorder %s1014_s1, %s933_s13  ;;  %p937_p1 = scmp.lt.u32.totalorder %s933_s13, %s1014_s1 }
   0x4   :  { %p939_p2 = pnand %p937_p1, %p934_p0 }
   0x6   :  { %942 = shalt.err (!%p939_p2)
}
   0x7   :  { %s943_s18 = scalar_lea.vmem %s16_s10, 10752  ;;  %p948_p4 = scmp.lt.s32.totalorder %s16_s10, %s16_s10 }
   0x8   :  { %p944_p3 = scmp.ne.s32.totalorder %s16_s10, %s943_s18  ;;  %p949_p5 = scmp.lt.s32.totalorder %s943_s18, %s943_s18 }
   0xa   :  { %p950_p6 = por %p949_p5, %p948_p4 }
   0xc   :  { %p951_p7 = pnand %p950_p6, %p944_p3 }
   0xe   :  { %954 = shalt.err (!%p951_p7)
}
   0xf   :  { %s958_s19 = smov 128   ;;  %s959_s20 = smov 8  }
  0x10   :  { %21 = dma.hbm_to_vmem [thread:$0]  %s1014_s1, 10752, %s16_s10, [#allocation4], %s958_s19, %s958_s19, %s959_s20  }
  0x11   :  { %955 = dma.done.wait [#allocation4], 10752  }
  0x12   :  { %956 = vsyncadd [#allocation4], 4294956544  ;;  %vm26_vm0 = vcmask 130048   ;;  %v960_v0 = vmov 0.0   ;;  %vm961_vm1 = vmmov 0   ;;  %vm31_vm2 = vcmask 31744  }
  0x13   :  { %822 = vmatprep.subr.bf16.mxu0 %v960_v0  ;;  %824 = vmatprep.mubr.msk.bf16.mxu0 %vm961_vm1, %v960_v0  ;;  %27 = vst.msk [vmem:[#allocation2] sm:$0xff] %vm26_vm0, %v960_v0  ;;  %28 = vst.msk [vmem:[#allocation2 + $0x8] sm:$0xff] %vm26_vm0, %v960_v0  ;;  %v834_v1 = vld [vmem:[#allocation3] ss:$8 sps:$4 sm:$0xff]   ;;  %v29_v2 = vld [vmem:[%s1013_s0] sm:$0xff]  ;;  %v962_v38 = vmov 0  }
  0x14   :  { %v30_v3 = vld [vmem:[%s1013_s0 + $0x8] sm:$0xff]  ;;  %823 = vmatpush3.bf16.msra.mxu0 %v834_v1  ;;  %32 = vst.msk [vmem:[#allocation2] sm:$0xff] %vm31_vm2, %v29_v2  ;;  %v838_v6 = vld [vmem:[#allocation3 + $0x24] ss:$8 sps:$4 sm:$0xff]   ;;  %v840_v7 = vld [vmem:[#allocation3 + $0x20] ss:$8 sps:$4 sm:$0xff]   ;;  %259 = vmatprep.mubr.bf16.mxu1 %v962_v38  ;;  %v64_v1 = vlaneseq }
  0x15   :  { %33 = vst.msk [vmem:[#allocation2 + $0x8] sm:$0xff] %vm31_vm2, %v30_v3  ;;  %v835_v4 = vld [vmem:[#allocation3 + $0x14] ss:$8 sps:$4 sm:$0xff]   ;;  %v837_v5 = vld [vmem:[#allocation3 + $0x10] ss:$8 sps:$4 sm:$0xff]   ;;  %vm724_vm3 = vcmask 15360  }
  0x16   :  { %227 = vmatprep.subr.bf16.mxu1 %v835_v4  ;;  %v841_v8 = vld [vmem:[#allocation3 + $0x34] ss:$8 sps:$4 sm:$0xff]   ;;  %v843_v11 = vld [vmem:[#allocation3 + $0x30] ss:$8 sps:$4 sm:$0xff]   ;;  %v844_v14 = vld [vmem:[#allocation3 + $0x44] ss:$8 sps:$4 sm:$0xff]  }
  0x17   :  { %228 = vmatpush1.bf16.msra.mxu1 %v837_v5  ;;  %v846_v15 = vld [vmem:[#allocation3 + $0x40] ss:$8 sps:$4 sm:$0xff]   ;;  %v847_v18 = vld [vmem:[#allocation3 + $0x54] ss:$8 sps:$4 sm:$0xff]   ;;  %v849_v21 = vld [vmem:[#allocation3 + $0x50] ss:$8 sps:$4 sm:$0xff]  }
  0x18   :  { %229 = vmatprep.subr.bf16.mxu1 %v838_v6  ;;  %v850_v22 = vld [vmem:[#allocation3 + $0x64] ss:$8 sps:$4 sm:$0xff]   ;;  %v852_v33 = vld [vmem:[#allocation3 + $0x60] ss:$8 sps:$4 sm:$0xff]   ;;  %v853_v34 = vld [vmem:[#allocation3 + $0x74] ss:$8 sps:$4 sm:$0xff]  }
  0x19   :  { %v855_v35 = vld [vmem:[#allocation3 + $0x70] ss:$8 sps:$4 sm:$0xff]   ;;  %v856_v36 = vld [vmem:[#allocation3 + $0x84] ss:$8 sps:$4 sm:$0xff]   ;;  %v858_v37 = vld [vmem:[#allocation3 + $0x80] ss:$8 sps:$4 sm:$0xff]  }
  0x1a   :  { %v859_v39 = vld [vmem:[#allocation3 + $0x90] ss:$8 sps:$4 sm:$0xff]   ;;  %v861_v40 = vld [vmem:[#allocation3 + $0x94] ss:$8 sps:$4 sm:$0xff]   ;;  %v864_v41 = vld [vmem:[#allocation3 + $0xa4] ss:$8 sps:$4 sm:$0xff]  }
  0x1b   :  { %v34_v9 = vld [vmem:[#allocation2] sm:$0xff]  ;;  %230 = vmatpush1.bf16.msra.mxu1 %v840_v7  ;;  %480 = vmatprep.subr.bf16.mxu0 %v861_v40  ;;  %v862_v42 = vld [vmem:[#allocation3 + $0xa0] ss:$8 sps:$4 sm:$0xff]   ;;  %v870_v45 = vld [vmem:[#allocation3 + $0xc4] ss:$8 sps:$4 sm:$0xff]   ;;  %v1001_v2 = vshrl.u32 %v64_v1, 7 }
  0x1c   :  { %v35_v10 = vld [vmem:[#allocation2 + $0x8] sm:$0xff]  ;;  %v36_v12 = vmul.f32 %v34_v9, %v34_v9  ;;  %231 = vmatprep.subr.bf16.mxu1 %v841_v8  ;;  %v868_v46 = vld [vmem:[#allocation3 + $0xc0] ss:$8 sps:$4 sm:$0xff]   ;;  %v876_v49 = vld [vmem:[#allocation3 + $0xe4] ss:$8 sps:$4 sm:$0xff]  }
  0x1d   :  { %v37_v13 = vmul.f32 %v35_v10, %v35_v10  ;;  %v867_v43 = vld [vmem:[#allocation3 + $0xb4] ss:$8 sps:$4 sm:$0xff]   ;;  %v865_v44 = vld [vmem:[#allocation3 + $0xb0] ss:$8 sps:$4 sm:$0xff]   ;;  %v874_v50 = vld [vmem:[#allocation3 + $0xe0] ss:$8 sps:$4 sm:$0xff]  }
  0x1e   :  { %v38_v16 = vsel %vm26_vm0, %v36_v12, 0.0  ;;  %v873_v47 = vld [vmem:[#allocation3 + $0xd4] ss:$8 sps:$4 sm:$0xff]   ;;  %v871_v48 = vld [vmem:[#allocation3 + $0xd0] ss:$8 sps:$4 sm:$0xff]   ;;  %v66_v5 = vsub.s32 0, %v1001_v2 }
  0x1f   :  { %v39_v17 = vsel %vm26_vm0, %v37_v13, 0.0  ;;  %232 = vmatpush1.bf16.msra.mxu1 %v843_v11  ;;  %v879_v51 = vld [vmem:[#allocation3 + $0xf4] ss:$8 sps:$4 sm:$0xff]   ;;  %v877_v52 = vld [vmem:[#allocation3 + $0xf0] ss:$8 sps:$4 sm:$0xff]  }
  0x20   :  { %v40_v19 = vadd.f32 %v39_v17, %v38_v16  ;;  %233 = vmatprep.subr.bf16.mxu1 %v844_v14  ;;  %v882_v53 = vld [vmem:[#allocation3 + $0x104] ss:$8 sps:$4 sm:$0xff]   ;;  %v880_v54 = vld [vmem:[#allocation3 + $0x100] ss:$8 sps:$4 sm:$0xff]   ;;  %v885_v55 = vld [vmem:[#allocation3 + $0x114] ss:$8 sps:$4 sm:$0xff]  }
  0x21   :  { %v883_v56 = vld [vmem:[#allocation3 + $0x110] ss:$8 sps:$4 sm:$0xff]   ;;  %v888_v57 = vld [vmem:[#allocation3 + $0x124] ss:$8 sps:$4 sm:$0xff]   ;;  %v886_v58 = vld [vmem:[#allocation3 + $0x120] ss:$8 sps:$4 sm:$0xff]  }
  0x22   :  { %v41_v20 = vrot.slane %v40_v19, 4  ;;  %v891_v59 = vld [vmem:[#allocation3 + $0x134] ss:$8 sps:$4 sm:$0xff]   ;;  %v889_v60 = vld [vmem:[#allocation3 + $0x130] ss:$8 sps:$4 sm:$0xff]  }
  0x23   :  { %234 = vmatpush1.bf16.msra.mxu1 %v846_v15  ;;  %v894_v61 = vld [vmem:[#allocation3 + $0x144] ss:$8 sps:$4 sm:$0xff]   ;;  %v892_v62 = vld [vmem:[#allocation3 + $0x140] ss:$8 sps:$4 sm:$0xff]   ;;  %v897_v63 = vld [vmem:[#allocation3 + $0x154] ss:$8 sps:$4 sm:$0xff]  }
  0x24   :  { %v42_v23 = vadd.f32 %v41_v20, %v40_v19  ;;  %235 = vmatprep.subr.bf16.mxu1 %v847_v18  ;;  %v895_v0 = vld [vmem:[#allocation3 + $0x150] ss:$8 sps:$4 sm:$0xff]   ;;  %v900_v18 = vld [vmem:[#allocation3 + $0x164] ss:$8 sps:$4 sm:$0xff]   ;;  %v898_v19 = vld [vmem:[#allocation3 + $0x160] ss:$8 sps:$4 sm:$0xff]  }
  0x25   :  { %v51_v3 = vld [vmem:[#allocation3 + $0x290] sm:$0x1]  ;;  %v903_v20 = vld [vmem:[#allocation3 + $0x174] ss:$8 sps:$4 sm:$0xff]  }
  0x26   :  { %v43_v24 = vrot.slane %v42_v23, 2  ;;  %v52_v4 = vunpack.c.l.bf16 %v51_v3  ;;  %v314_v3 = vsub.s32 2, %v1001_v2 }
  0x27   :  { %236 = vmatpush1.bf16.msra.mxu1 %v849_v21  ;;  %v901_v21 = vld [vmem:[#allocation3 + $0x170] ss:$8 sps:$4 sm:$0xff]  }
  0x28   :  { %v44_v25 = vadd.f32 %v43_v24, %v42_v23  ;;  %237 = vmatprep.subr.bf16.mxu1 %v850_v22  ;;  %v67_v6 = vrot.slane %v52_v4, %v66_v5  ;;  %v906_v22 = vld [vmem:[#allocation3 + $0x184] ss:$8 sps:$4 sm:$0xff]   ;;  %v904_v23 = vld [vmem:[#allocation3 + $0x180] ss:$8 sps:$4 sm:$0xff]   ;;  %v907_v24 = vld [vmem:[#allocation3 + $0x210] ss:$8 sps:$4 sm:$0xff]  }
  0x2a   :  { %v45_v26 = vrot.slane %v44_v25, 1 }
  0x2b   :  { %238 = vmatpush1.bf16.msra.mxu1 %v852_v33  ;;  %v916_v33 = vld [vmem:[#allocation3 + $0x1d0] ss:$8 sps:$4 sm:$0xff]  }
  0x2c   :  { %v46_v27 = vadd.f32 %v45_v26, %v44_v25  ;;  %239 = vmatprep.subr.bf16.mxu1 %v853_v34  ;;  %v908_v25 = vld [vmem:[#allocation3 + $0x190] ss:$8 sps:$4 sm:$0xff]   ;;  %v909_v26 = vld [vmem:[#allocation3 + $0x220] ss:$8 sps:$4 sm:$0xff]  }
  0x2d   :  { %v53_v34 = vld [vmem:[#allocation3 + $0x290] sm:$0x11] }
  0x2e   :  { %v47_v28 = vmax.f32 %v46_v27, 1e-24  ;;  %v910_v27 = vld [vmem:[#allocation3 + $0x1a0] ss:$8 sps:$4 sm:$0xff]  }
  0x2f   :  { %240 = vmatpush1.bf16.msra.mxu1 %v855_v35  ;;  %v54_v35 = vunpack.c.l.bf16 %v53_v34 }
  0x30   :  { %923 = vrsqrt.f32 %v47_v28  ;;  %241 = vmatprep.subr.bf16.mxu1 %v856_v36  ;;  %v911_v28 = vld [vmem:[#allocation3 + $0x230] ss:$8 sps:$4 sm:$0xff]   ;;  %v141_v36 = vsub.s32 1, %v1001_v2 }
  0x32   :  { %v142_v38 = vrot.slane %v54_v35, %v141_v36 }
  0x33   :  { %242 = vmatpush1.bf16.msra.mxu1 %v858_v37  ;;  %v55_v37 = vunpack.c.h.bf16 %v53_v34 }
  0x34   :  { %800 = vmatprep.subr.bf16.mxu1 %v907_v24 }
  0x3a   :  { %v924_v29 = vpop.eup %923 }
  0x3b   :  { %v49_v30 = vmul.f32 %v924_v29, %v34_v9  ;;  %v50_v31 = vmul.f32 %v924_v29, %v35_v10  ;;  %v912_v29 = vld [vmem:[#allocation3 + $0x1b0] ss:$8 sps:$4 sm:$0xff]  }
  0x3d   :  { %v61_v32 = vpack.c.bf16 %v50_v31, %v49_v30  ;;  %v913_v30 = vld [vmem:[#allocation3 + $0x240] ss:$8 sps:$4 sm:$0xff]  }
  0x3e   :  { %v914_v31 = vld [vmem:[#allocation3 + $0x1c0] ss:$8 sps:$4 sm:$0xff]  }
  0x3f   :  { %825 = vmatmul.mubr.msk.bf16.vlgmr.msra.gmra.mrb[0].mxu0 %vm26_vm0, %v61_v32  ;;  %v915_v32 = vld [vmem:[#allocation3 + $0x250] ss:$8 sps:$4 sm:$0xff]  }
  0x40   :  { %481 = vmatpush1.bf16.msra.mxu0 %v859_v39  ;;  %v146_v39 = vrot.slane %v55_v37, %v141_v36 }
  0x41   :  { %482 = vmatprep.subr.bf16.mxu0 %v864_v41 }
  0x44   :  { %483 = vmatpush1.bf16.msra.mxu0 %v862_v42 }
  0x45   :  { %484 = vmatprep.subr.bf16.mxu0 %v867_v43 }
  0x48   :  { %485 = vmatpush1.bf16.msra.mxu0 %v865_v44 }
  0x49   :  { %486 = vmatprep.subr.bf16.mxu0 %v870_v45 }
  0x4c   :  { %487 = vmatpush1.bf16.msra.mxu0 %v868_v46 }
  0x4d   :  { %488 = vmatprep.subr.bf16.mxu0 %v873_v47 }
  0x50   :  { %489 = vmatpush1.bf16.msra.mxu0 %v871_v48 }
  0x51   :  { %490 = vmatprep.subr.bf16.mxu0 %v876_v49 }
  0x54   :  { %491 = vmatpush1.bf16.msra.mxu0 %v874_v50 }
  0x55   :  { %492 = vmatprep.subr.bf16.mxu0 %v879_v51 }
  0x58   :  { %493 = vmatpush1.bf16.msra.mxu0 %v877_v52 }
  0x59   :  { %494 = vmatprep.subr.bf16.mxu0 %v882_v53 }
  0x5c   :  { %495 = vmatpush1.bf16.msra.mxu0 %v880_v54 }
  0x5d   :  { %496 = vmatprep.subr.bf16.mxu0 %v885_v55 }
  0x60   :  { %497 = vmatpush1.bf16.msra.mxu0 %v883_v56 }
  0x61   :  { %498 = vmatprep.subr.bf16.mxu0 %v888_v57 }
  0x64   :  { %499 = vmatpush1.bf16.msra.mxu0 %v886_v58  ;;  %v917_v58 = vld [vmem:[#allocation3 + $0x260] ss:$8 sps:$4 sm:$0xff]  }
  0x65   :  { %500 = vmatprep.subr.bf16.mxu0 %v891_v59  ;;  %v918_v59 = vld [vmem:[#allocation3 + $0x1e0] ss:$8 sps:$4 sm:$0xff]  }
  0x68   :  { %501 = vmatpush1.bf16.msra.mxu0 %v889_v60  ;;  %v919_v60 = vld [vmem:[#allocation3 + $0x270] ss:$8 sps:$4 sm:$0xff]  }
  0x69   :  { %502 = vmatprep.subr.bf16.mxu0 %v894_v61  ;;  %v920_v61 = vld [vmem:[#allocation3 + $0x1f0] ss:$8 sps:$4 sm:$0xff]  }
  0x6c   :  { %503 = vmatpush1.bf16.msra.mxu0 %v892_v62  ;;  %v921_v62 = vld [vmem:[#allocation3 + $0x280] ss:$8 sps:$4 sm:$0xff]  }
  0x6d   :  { %504 = vmatprep.subr.bf16.mxu0 %v897_v63  ;;  %v922_v63 = vld [vmem:[#allocation3 + $0x200] ss:$8 sps:$4 sm:$0xff]  }
  0x70   :  { %505 = vmatpush1.bf16.msra.mxu0 %v895_v0  ;;  %v56_v0 = vld [vmem:[#allocation3 + $0x290] sm:$0x22] }
  0x71   :  { %506 = vmatprep.subr.bf16.mxu0 %v900_v18  ;;  %v57_v1 = vunpack.c.l.bf16 %v56_v0  ;;  %v58_v4 = vunpack.c.h.bf16 %v56_v0 }
  0x73   :  { %v315_v5 = vrot.slane %v57_v1, %v314_v3 }
  0x74   :  { %507 = vmatpush1.bf16.msra.mxu0 %v898_v19 }
  0x75   :  { %508 = vmatprep.subr.bf16.mxu0 %v903_v20 }
  0x78   :  { %509 = vmatpush1.bf16.msra.mxu0 %v901_v21 }
  0x79   :  { %510 = vmatprep.subr.bf16.mxu0 %v906_v22 }
  0x7c   :  { %511 = vmatpush1.bf16.msra.mxu0 %v904_v23 }
 0x112   :  { %v111_v7 = vpop.f32.mrb[0].mxu0 }
 0x113   :  { %v112_v8 = vadd.f32 %v111_v7, %v67_v6  ;;  %v826_v9 = vpop.f32.mrb[1].mxu0 }
 0x114   :  { %v114_v10 = vpop.f32.mrb[2].mxu0 }
 0x115   :  { %v118_v11 = vmul.f32 0.01, %v112_v8  ;;  %v115_v12 = vadd.f32 %v114_v10, %v67_v6  ;;  %v827_v13 = vpop.f32.mrb[3].mxu0  ;;  %v319_v6 = vrot.slane %v58_v4, %v314_v3 }
 0x117   :  { %v119_v14 = vmul.f32 0.01, %v115_v12  ;;  %v120_v15 = vmax.f32 %v112_v8, %v118_v11 }
 0x119   :  { %v121_v16 = vmax.f32 %v115_v12, %v119_v14 }
 0x11b   :  { %v122_v17 = vpack.c.bf16 %v121_v16, %v120_v15 }
 0x11d   :  { %260 = vmatmul.mubr.bf16.vlgmr.msra.gmra.mrb[0].mxu1 %v122_v17 }
 0x11e   :  { %801 = vmatpush3.bf16.msra.mxu1 %v908_v25  ;;  %v59_v25 = vld [vmem:[#allocation3 + $0x290] sm:$0x2] }
 0x11f   :  { %802 = vmatprep.subr.bf16.mxu1 %v909_v26  ;;  %v60_v26 = vunpack.c.l.bf16 %v59_v25 }
 0x122   :  { %803 = vmatpush3.bf16.msra.mxu1 %v910_v27  ;;  %v567_v27 = vsub.s32 3, %v1001_v2 }
 0x123   :  { %804 = vmatprep.subr.bf16.mxu1 %v911_v28 }
 0x126   :  { %805 = vmatpush3.bf16.msra.mxu1 %v912_v29  ;;  %v568_v29 = vrot.slane %v60_v26, %v567_v27 }
 0x127   :  { %806 = vmatprep.subr.bf16.mxu1 %v913_v30 }
 0x12a   :  { %807 = vmatpush3.bf16.msra.mxu1 %v914_v31 }
 0x12b   :  { %808 = vmatprep.subr.bf16.mxu1 %v915_v32 }
 0x12e   :  { %809 = vmatpush3.bf16.msra.mxu1 %v916_v33 }
 0x12f   :  { %810 = vmatprep.subr.bf16.mxu1 %v917_v58 }
 0x132   :  { %811 = vmatpush3.bf16.msra.mxu1 %v918_v59 }
 0x133   :  { %812 = vmatprep.subr.bf16.mxu1 %v919_v60 }
 0x136   :  { %813 = vmatpush3.bf16.msra.mxu1 %v920_v61 }
 0x137   :  { %814 = vmatprep.subr.bf16.mxu1 %v921_v62 }
 0x13a   :  { %815 = vmatpush3.bf16.msra.mxu1 %v922_v63 }
 0x1f0   :  { %v261_v40 = vpop.f32.mrb[0].mxu1 }
 0x1f1   :  { %v262_v41 = vadd.f32 %v261_v40, %v142_v38  ;;  %v263_v42 = vpop.f32.mrb[1].mxu1 }
 0x1f2   :  { %v264_v43 = vadd.f32 %v263_v42, %v146_v39  ;;  %v265_v44 = vpop.f32.mrb[2].mxu1 }
 0x1f3   :  { %v270_v45 = vmul.f32 0.01, %v262_v41  ;;  %v266_v46 = vadd.f32 %v265_v44, %v142_v38  ;;  %v267_v47 = vpop.f32.mrb[3].mxu1 }
 0x1f4   :  { %v271_v48 = vmul.f32 0.01, %v264_v43  ;;  %v268_v49 = vadd.f32 %v267_v47, %v146_v39 }
 0x1f5   :  { %v272_v50 = vmul.f32 0.01, %v266_v46  ;;  %v274_v52 = vmax.f32 %v262_v41, %v270_v45 }
 0x1f6   :  { %v273_v51 = vmul.f32 0.01, %v268_v49  ;;  %v275_v54 = vmax.f32 %v264_v43, %v271_v48 }
 0x1f7   :  { %v276_v53 = vmax.f32 %v266_v46, %v272_v50 }
 0x1f8   :  { %v277_v55 = vmax.f32 %v268_v49, %v273_v51 }
 0x1f9   :  { %v278_v56 = vpack.c.bf16 %v276_v53, %v274_v52 }
 0x1fa   :  { %v279_v57 = vpack.c.bf16 %v277_v55, %v275_v54 }
 0x1fc   :  { %512 = vmatprep.mubr.bf16.mxu0 %v279_v57 }
 0x1fd   :  { %513 = vmatmul.mubr.bf16.vlgmr.msra.gmra.mrb[4].mxu0 %v278_v56 }
 0x2d0   :  { %v514_v7 = vpop.f32.mrb[4].mxu0 }
 0x2d1   :  { %v515_v8 = vadd.f32 %v514_v7, %v315_v5  ;;  %v516_v9 = vpop.f32.mrb[5].mxu0 }
 0x2d2   :  { %v517_v10 = vadd.f32 %v516_v9, %v319_v6  ;;  %v518_v11 = vpop.f32.mrb[6].mxu0 }
 0x2d3   :  { %v523_v12 = vmul.f32 0.01, %v515_v8  ;;  %v519_v13 = vadd.f32 %v518_v11, %v315_v5  ;;  %v520_v14 = vpop.f32.mrb[7].mxu0 }
 0x2d4   :  { %v524_v15 = vmul.f32 0.01, %v517_v10  ;;  %v521_v16 = vadd.f32 %v520_v14, %v319_v6 }
 0x2d5   :  { %v525_v17 = vmul.f32 0.01, %v519_v13  ;;  %v527_v19 = vmax.f32 %v515_v8, %v523_v12 }
 0x2d6   :  { %v526_v18 = vmul.f32 0.01, %v521_v16  ;;  %v528_v21 = vmax.f32 %v517_v10, %v524_v15 }
 0x2d7   :  { %v529_v20 = vmax.f32 %v519_v13, %v525_v17 }
 0x2d8   :  { %v530_v22 = vmax.f32 %v521_v16, %v526_v18 }
 0x2d9   :  { %v531_v23 = vpack.c.bf16 %v529_v20, %v527_v19 }
 0x2da   :  { %v532_v24 = vpack.c.bf16 %v530_v22, %v528_v21 }
 0x2dc   :  { %697 = vmatprep.mubr.bf16.mxu1 %v532_v24 }
 0x2dd   :  { %698 = vmatmul.mubr.bf16.vlgmr.msra.gmra.mrb[4].mxu1 %v531_v23 }
 0x3b0   :  { %v816_v28 = vpop.f32.mrb[4].mxu1 }
 0x3b1   :  { %v817_v30 = vpop.f32.mrb[5].mxu1 }
 0x3b2   :  { %v818_v31 = vadd.f32 %v817_v30, %v816_v28  ;;  %v819_v32 = vpop.f32.mrb[6].mxu1 }
 0x3b3   :  { %v820_v33 = vpop.f32.mrb[7].mxu1 }
 0x3b4   :  { %v821_v34 = vadd.f32 %v820_v33, %v819_v32  ;;  %v700_v35 = vadd.f32 %v818_v31, %v568_v29 }
 0x3b6   :  { %706 = vmax.xlane.f32.xlu0 %v700_v35  ;;  %v703_v36 = vadd.f32 %v821_v34, %v568_v29 }
 0x3ba   :  { %708 = vmax.xlane.f32.xlu0 %v703_v36 }
 0x443   :  { %v707_v37 = vpop.xlane.xlu0 %706 }
 0x444   :  { %v710_v38 = vsub.f32 %v700_v35, %v707_v37 }
 0x446   :  { %v712_v39 = vmul.f32 1.442695, %v710_v38 }
 0x447   :  { %v709_v40 = vpop.xlane.xlu0 %708 }
 0x448   :  { %925 = vpow2.f32 %v712_v39  ;;  %v711_v41 = vsub.f32 %v703_v36, %v709_v40 }
 0x44a   :  { %v714_v42 = vmul.f32 1.442695, %v711_v41 }
 0x44c   :  { %927 = vpow2.f32 %v714_v42 }
 0x452   :  { %v926_v2 = vpop.eup %925 }
 0x453   :  { %716 = vadd.xlane.f32.xlu1 %v926_v2 }
 0x456   :  { %v928_v43 = vpop.eup %927 }
 0x457   :  { %718 = vadd.xlane.f32.xlu1 %v928_v43 }
 0x4e0   :  { %v717_v44 = vpop.xlane.xlu1 %716 }
 0x4e1   :  { %929 = vrcp.f32 %v717_v44 }
 0x4e4   :  { %v719_v45 = vpop.xlane.xlu1 %718 }
 0x4e5   :  { %931 = vrcp.f32 %v719_v45 }
 0x4eb   :  { %v930_v46 = vpop.eup %929 }
 0x4ec   :  { %v721_v47 = vmul.f32 %v930_v46, %v926_v2 }
 0x4ee   :  { %725 = vst.msk [vmem:[%s1015_s2] sm:$0xff] %vm724_vm3, %v721_v47 }
 0x4ef   :  { %v932_v48 = vpop.eup %931 }
 0x4f0   :  { %v723_v49 = vmul.f32 %v932_v48, %v928_v43 }
 0x4f2   :  { %726 = vst.msk [vmem:[%s1015_s2 + $0x8] sm:$0xff] %vm724_vm3, %v723_v49 }
 0x4f3   :  { %731 = vsyncpa [#allocation4], 1 }

</bundles_post_ra>
